<compile_context>
chip_gen: v7x
topology: tpu7x:2x2x1
jax: 0.10.0
libtpu: 0.0.40
codegen_flags: <defaults>
</compile_context>

<pallas_src>
import functools

import jax
import jax.numpy as jnp
from jax.experimental import pallas as pl
from jax.experimental.pallas import tpu as pltpu


def attention_kernel(enc_ref, att2_ref, we_ref, wf_ref, awe_ref, alpha_ref, *,
                     p_actual):
    TB, P, E = enc_ref.shape          # P is the padded pixel count
    A = we_ref.shape[1]

    enc = enc_ref[...]                                            # (TB, P, E) bf16

    # Encoder projection: fuse batch*pixels into one big-M MXU matmul.
    # P is padded to a multiple of 16 in the wrapper, so this reshape is
    # layout-free for packed bf16 (no relayout copy).
    att1 = jnp.dot(enc.reshape(TB * P, E), we_ref[...],
                   preferred_element_type=jnp.float32).reshape(TB, P, A)

    # Add the hoisted decoder projection (biases folded in) and ReLU — f32 VPU.
    h = jnp.maximum(att1 + att2_ref[...][:, None, :], 0.0)        # (TB, P, A) f32

    # full_att (A -> 1) as VPU multiply + lane reduce; logits lane-dense (TB, P).
    logits = jnp.sum(h * wf_ref[...][None, :, :], axis=-1)        # (TB, P) f32

    # Mask the padded pixel rows before the softmax.
    if p_actual < P:
        pix = jax.lax.broadcasted_iota(jnp.int32, (TB, P), 1)
        logits = jnp.where(pix < p_actual, logits, -jnp.inf)

    # Softmax over the pixel axis (lanes); divide goes to the EUP slot.
    m = jnp.max(logits, axis=-1, keepdims=True)                   # (TB, 1)
    e = jnp.exp(logits - m)                                       # (TB, P)
    denom = jnp.sum(e, axis=-1, keepdims=True)                    # (TB, 1)
    alpha = e * pl.reciprocal(denom, approx=True)                 # (TB, P)
    alpha_ref[...] = alpha.astype(alpha_ref.dtype)

    # Attention-weighted encoding: VPU broadcast-multiply + sublane reduce over
    # P (M=1 matmuls would waste the MXU, which is now the binding unit).
    awe = jnp.sum(enc.astype(jnp.float32) * alpha[:, :, None], axis=1)  # (TB, E)
    awe_ref[...] = awe.astype(awe_ref.dtype)


def _vmem_budget_bytes():
    """~60% of physical VMEM (64 MiB on v7x, 128 MiB on v5e/v6e)."""
    try:
        cap = pltpu.get_tpu_info().vmem_capacity_bytes
    except Exception:
        cap = 128 * 1024 * 1024
    return int(cap * 0.6)


def _pick_tb(B, P_pad, E, A, budget_bytes):
    """Pick (TB, B_pad): batch elements per grid step and padded batch size.

    TB*P_pad rows form the fused MXU M dimension.  TB is a multiple of 8
    (sublane constraint for the 2-D (TB,A)/(TB,P)/(TB,E) blocks) chosen so the
    double-buffered bf16 enc block, the f32 intermediates and the weight
    buffers all fit in the per-generation VMEM budget.  B is padded to a
    multiple of TB (never falls back to a single giant TB=B block).
    """
    if B <= 8:
        return B, B
    B_pad = -(-B // 8) * 8
    bytes_per_b = (2 * P_pad * E * 2          # enc block (bf16, double-buffered)
                   + 2 * A * 4                # att2 block
                   + 2 * E * 4                # awe output block
                   + 2 * P_pad * 4            # alpha output block
                   + 2 * P_pad * A * 4        # att1 / h f32 intermediates
                   + P_pad * E * 4)           # enc*alpha f32 product
    fixed = 2 * E * A * 2 + 2 * A * 4         # weights (worst case double-buffered)
    vmem_cap = max(8, (budget_bytes - fixed) // max(bytes_per_b, 1))
    rows_cap = max(8, 4096 // max(P_pad, 1))  # keep fused M at a few thousand rows
    cap = min(B_pad, vmem_cap, rows_cap)
    cap = max(8, (cap // 8) * 8)
    tb = 8
    for cand in range(cap, 7, -8):
        if B_pad % cand == 0:
            tb = cand
            break
    return tb, B_pad


def attention_forward(encoder_out, decoder_hidden, params):
    we, be, wd, bd, wf = (params["we"], params["be"], params["wd"],
                          params["bd"], params["wf"])
    B, P, E = encoder_out.shape
    A = we.shape[1]

    # Hoist the decoder projection out of the kernel, fold both linear biases
    # into it, drop the full_att bias (softmax shift-invariance).
    att2 = (decoder_hidden @ wd + bd + be).astype(jnp.float32)       # (B, A)
    wf_row = wf.reshape(1, A).astype(jnp.float32)                    # (1, A)

    # Pad pixels to a multiple of 16 -> layout-free flatten for packed bf16.
    P_pad = -(-P // 16) * 16

    budget = _vmem_budget_bytes()
    TB, B_pad = _pick_tb(B, P_pad, E, A, budget)
    B_pad = -(-B_pad // TB) * TB

    # bf16 MXU operands; accumulation stays f32 via preferred_element_type.
    enc = encoder_out.astype(jnp.bfloat16)
    if B_pad != B or P_pad != P:
        enc = jnp.pad(enc, ((0, B_pad - B), (0, P_pad - P), (0, 0)))
    if B_pad != B:
        att2 = jnp.pad(att2, ((0, B_pad - B), (0, 0)))
    we_b = we.astype(jnp.bfloat16)

    kernel = functools.partial(attention_kernel, p_actual=P)
    grid = (B_pad // TB,)

    def run(single_buffer_weights):
        # Grid-invariant weights: a single buffer reclaims VMEM (most valuable
        # on v7x's 64 MiB); Pallas skips re-DMA either way (constant index_map).
        w_kw = dict(pipeline_mode=pl.Buffered(1)) if single_buffer_weights else {}
        return pl.pallas_call(
            kernel,
            out_shape=(
                jax.ShapeDtypeStruct((B_pad, E), jnp.float32),       # awe
                jax.ShapeDtypeStruct((B_pad, P_pad), jnp.float32),   # alpha (lane-dense)
            ),
            grid=grid,
            in_specs=[
                pl.BlockSpec((TB, P_pad, E), lambda b: (b, 0, 0)),   # encoder block
                pl.BlockSpec((TB, A),        lambda b: (b, 0)),      # att2 (+ biases)
                pl.BlockSpec((E, A), lambda b: (0, 0), **w_kw),      # W_encoder_att (bf16)
                pl.BlockSpec((1, A), lambda b: (0, 0), **w_kw),      # W_full_att row
            ],
            out_specs=(
                pl.BlockSpec((TB, E),     lambda b: (b, 0)),
                pl.BlockSpec((TB, P_pad), lambda b: (b, 0)),
            ),
            compiler_params=pltpu.CompilerParams(
                dimension_semantics=("parallel",),
                vmem_limit_bytes=int(budget)),
        )(enc, att2, we_b, wf_row)

    try:
        awe, alpha = run(True)
    except Exception:
        # pipeline_mode=pl.Buffered(1) unsupported on this jax build; retry
        # with default double-buffering (correctness unchanged).
        awe, alpha = run(False)

    return awe[:B], alpha[:B, :P]


def init_params(key, encoder_dim, decoder_dim, attention_dim):
    """Deterministic init mimicking PyTorch nn.Linear U(-1/sqrt(fan_in), 1/sqrt(fan_in))."""
    k = jax.random.split(key, 6)

    def lin(kw, kb, fan_in, fan_out):
        bound = 1.0 / jnp.sqrt(fan_in)
        w = jax.random.uniform(kw, (fan_in, fan_out), jnp.float32, -bound, bound)
        b = jax.random.uniform(kb, (1, fan_out), jnp.float32, -bound, bound)
        return w, b

    we, be = lin(k[0], k[1], encoder_dim, attention_dim)
    wd, bd = lin(k[2], k[3], decoder_dim, attention_dim)
    wf, bf = lin(k[4], k[5], attention_dim, 1)
    return {"we": we, "be": be, "wd": wd, "bd": bd, "wf": wf, "bf": bf}


def reference_forward(encoder_out, decoder_hidden, p):
    att1 = encoder_out @ p["we"] + p["be"][0]                 # (B, P, A)
    att2 = decoder_hidden @ p["wd"] + p["bd"][0]              # (B, A)
    h = jnp.maximum(att1 + att2[:, None, :], 0.0)
    att = (h @ p["wf"] + p["bf"][0])[..., 0]                  # (B, P)
    alpha = jax.nn.softmax(att, axis=1)
    awe = (encoder_out * alpha[:, :, None]).sum(axis=1)       # (B, E)
    return awe, alpha


if __name__ == "__main__":
    # Small shapes; P deliberately not a multiple of 16 to exercise the padded
    # pixel + mask path.
    B, P, E, D, A = 2, 14, 32, 24, 48
    key = jax.random.PRNGKey(0)
    k_enc, k_dec, k_param = jax.random.split(key, 3)

    encoder_out = jax.random.normal(k_enc, (B, P, E), jnp.float32)
    decoder_hidden = jax.random.normal(k_dec, (B, D), jnp.float32)
    params = init_params(k_param, E, D, A)

    awe, alpha = attention_forward(encoder_out, decoder_hidden, params)
    awe = jax.block_until_ready(awe)
    alpha = jax.block_until_ready(alpha)

    awe_ref, alpha_ref = reference_forward(encoder_out, decoder_hidden, params)
    assert awe.shape == (B, E) and alpha.shape == (B, P)
    # bf16 MXU operands + approx-reciprocal softmax -> relaxed tolerances.
    assert jnp.allclose(alpha, alpha_ref, atol=3e-2, rtol=3e-2), float(
        jnp.max(jnp.abs(alpha - alpha_ref)))
    assert jnp.allclose(awe, awe_ref, atol=5e-2, rtol=5e-2), float(
        jnp.max(jnp.abs(awe - awe_ref)))

    print("KERNEL_OK")
</pallas_src>

<mosaic_0001>
module attributes {stable_mosaic.version = 11 : i64} {
  func.func @attention_kernel(%arg0: i32, %arg1: memref<2x16x32xbf16, #tpu.memory_space<vmem>>, %arg2: memref<2x48xf32, #tpu.memory_space<vmem>>, %arg3: memref<32x48xbf16, #tpu.memory_space<vmem>>, %arg4: memref<1x48xf32, #tpu.memory_space<vmem>>, %arg5: memref<2x32xf32, #tpu.memory_space<vmem>>, %arg6: memref<2x16xf32, #tpu.memory_space<vmem>>) attributes {dimension_semantics = [#tpu.dimension_semantics<parallel>], iteration_bounds = array<i64: 1>, scalar_prefetch = 0 : i64, scratch_operands = 0 : i64, tpu.core_type = #tpu.core_type<tc>, window_params = [{transform_indices = @transform_0, window_bounds = array<i64: 2, 16, 32>}, {transform_indices = @transform_1, window_bounds = array<i64: 2, 48>}, {pipeline_mode = #tpu.pipeline_mode<synchronous>, transform_indices = @transform_2, window_bounds = array<i64: 32, 48>}, {pipeline_mode = #tpu.pipeline_mode<synchronous>, transform_indices = @transform_3, window_bounds = array<i64: 1, 48>}, {transform_indices = @transform_4, window_bounds = array<i64: 2, 32>}, {transform_indices = @transform_5, window_bounds = array<i64: 2, 16>}]} {
    %c0 = arith.constant 0 : index
    %c0_0 = arith.constant 0 : index
    %c0_1 = arith.constant 0 : index
    %0 = vector.load %arg1[%c0, %c0_0, %c0_1] : memref<2x16x32xbf16, #tpu.memory_space<vmem>>, vector<2x16x32xbf16>
    %1 = vector.shape_cast %0 : vector<2x16x32xbf16> to vector<32x32xbf16>
    %c0_2 = arith.constant 0 : index
    %c0_3 = arith.constant 0 : index
    %2 = vector.load %arg3[%c0_2, %c0_3] : memref<32x48xbf16, #tpu.memory_space<vmem>>, vector<32x48xbf16>
    %cst = arith.constant dense<0.000000e+00> : vector<32x48xf32>
    %3 = tpu.matmul %1, %2, %cst {dimension_numbers = #tpu.dot_dimension_numbers<[1], [0], [0], [1], [0, 0, 1, 1], [], []>} : vector<32x32xbf16>, vector<32x48xbf16>, vector<32x48xf32> -> vector<32x48xf32>
    %4 = vector.shape_cast %3 : vector<32x48xf32> to vector<2x16x48xf32>
    %c0_4 = arith.constant 0 : index
    %c0_5 = arith.constant 0 : index
    %5 = vector.load %arg2[%c0_4, %c0_5] : memref<2x48xf32, #tpu.memory_space<vmem>>, vector<2x48xf32>
    %6 = vector.shape_cast %5 : vector<2x48xf32> to vector<2x1x48xf32>
    %7 = vector.broadcast %6 : vector<2x1x48xf32> to vector<2x16x48xf32>
    %8 = arith.addf %4, %7 : vector<2x16x48xf32>
    %cst_6 = arith.constant 0.000000e+00 : f32
    %9 = vector.broadcast %cst_6 : f32 to vector<2x16x48xf32>
    %10 = arith.maximumf %8, %9 : vector<2x16x48xf32>
    %c0_7 = arith.constant 0 : index
    %c0_8 = arith.constant 0 : index
    %11 = vector.load %arg4[%c0_7, %c0_8] : memref<1x48xf32, #tpu.memory_space<vmem>>, vector<1x48xf32>
    %12 = vector.shape_cast %11 : vector<1x48xf32> to vector<1x1x48xf32>
    %13 = vector.broadcast %12 : vector<1x1x48xf32> to vector<2x16x48xf32>
    %14 = arith.mulf %10, %13 : vector<2x16x48xf32>
    %cst_9 = arith.constant dense<0.000000e+00> : vector<2x16xf32>
    %15 = vector.multi_reduction <add>, %14, %cst_9 [2] : vector<2x16x48xf32> to vector<2x16xf32>
    %16 = tpu.iota {dimensions = array<i32: 1>} : vector<2x16xi32>
    %c14_i32 = arith.constant 14 : i32
    %17 = vector.broadcast %c14_i32 : i32 to vector<2x16xi32>
    %18 = arith.cmpi slt, %16, %17 : vector<2x16xi32>
    %cst_10 = arith.constant 0xFF800000 : f32
    %19 = vector.broadcast %cst_10 : f32 to vector<2x16xf32>
    %20 = arith.select %18, %15, %19 : vector<2x16xi1>, vector<2x16xf32>
    %cst_11 = arith.constant dense<0xFF800000> : vector<2xf32>
    %21 = vector.multi_reduction <maximumf>, %20, %cst_11 [1] : vector<2x16xf32> to vector<2xf32>
    %22 = vector.shape_cast %21 : vector<2xf32> to vector<2x1xf32>
    %23 = vector.broadcast %22 : vector<2x1xf32> to vector<2x16xf32>
    %24 = arith.subf %20, %23 : vector<2x16xf32>
    %25 = math.exp %24 : vector<2x16xf32>
    %cst_12 = arith.constant dense<0.000000e+00> : vector<2xf32>
    %26 = vector.multi_reduction <add>, %25, %cst_12 [1] : vector<2x16xf32> to vector<2xf32>
    %27 = vector.shape_cast %26 : vector<2xf32> to vector<2x1xf32>
    %28 = tpu.reciprocal %27 {approx = true} : vector<2x1xf32> -> vector<2x1xf32>
    %29 = vector.broadcast %28 : vector<2x1xf32> to vector<2x16xf32>
    %30 = arith.mulf %25, %29 : vector<2x16xf32>
    %c0_13 = arith.constant 0 : index
    %c0_14 = arith.constant 0 : index
    %31 = vector.load %arg6[%c0_13, %c0_14] : memref<2x16xf32, #tpu.memory_space<vmem>>, vector<2x16xf32>
    tpu.vector_store %arg6[%c0_13, %c0_14], %30 {strides = array<i32>} : memref<2x16xf32, #tpu.memory_space<vmem>>, vector<2x16xf32>,
    %32 = arith.extf %0 : vector<2x16x32xbf16> to vector<2x16x32xf32>
    %33 = vector.shape_cast %30 : vector<2x16xf32> to vector<2x16x1xf32>
    %34 = vector.broadcast %33 : vector<2x16x1xf32> to vector<2x16x32xf32>
    %35 = arith.mulf %32, %34 : vector<2x16x32xf32>
    %cst_15 = arith.constant dense<0.000000e+00> : vector<2x32xf32>
    %36 = vector.multi_reduction <add>, %35, %cst_15 [1] : vector<2x16x32xf32> to vector<2x32xf32>
    %c0_16 = arith.constant 0 : index
    %c0_17 = arith.constant 0 : index
    %37 = vector.load %arg5[%c0_16, %c0_17] : memref<2x32xf32, #tpu.memory_space<vmem>>, vector<2x32xf32>
    tpu.vector_store %arg5[%c0_16, %c0_17], %36 {strides = array<i32>} : memref<2x32xf32, #tpu.memory_space<vmem>>, vector<2x32xf32>,
    return
  }
  func.func @transform_0(%arg0: i32) -> (i32, i32, i32) {
    %c0_i32 = arith.constant 0 : i32
    %c0_i32_0 = arith.constant 0 : i32
    %c0_i32_1 = arith.constant 0 : i32
    return %arg0, %c0_i32, %c0_i32_0 : i32, i32, i32
  }
  func.func @transform_1(%arg0: i32) -> (i32, i32) {
    %c0_i32 = arith.constant 0 : i32
    %c0_i32_0 = arith.constant 0 : i32
    return %arg0, %c0_i32 : i32, i32
  }
  func.func @transform_2(%arg0: i32) -> (i32, i32) {
    %c0_i32 = arith.constant 0 : i32
    %c0_i32_0 = arith.constant 0 : i32
    %c0_i32_1 = arith.constant 0 : i32
    return %c0_i32, %c0_i32_0 : i32, i32
  }
  func.func @transform_3(%arg0: i32) -> (i32, i32) {
    %c0_i32 = arith.constant 0 : i32
    %c0_i32_0 = arith.constant 0 : i32
    %c0_i32_1 = arith.constant 0 : i32
    return %c0_i32, %c0_i32_0 : i32, i32
  }
  func.func @transform_4(%arg0: i32) -> (i32, i32) {
    %c0_i32 = arith.constant 0 : i32
    %c0_i32_0 = arith.constant 0 : i32
    return %arg0, %c0_i32 : i32, i32
  }
  func.func @transform_5(%arg0: i32) -> (i32, i32) {
    %c0_i32 = arith.constant 0 : i32
    %c0_i32_0 = arith.constant 0 : i32
    return %arg0, %c0_i32 : i32, i32
  }
}

module attributes {stable_mosaic.version = 11 : i64} {
  func.func @attention_kernel(%arg0: i32, %arg1: memref<2x16x32xbf16, #tpu.memory_space<vmem>>, %arg2: memref<2x48xf32, #tpu.memory_space<vmem>>, %arg3: memref<32x48xbf16, #tpu.memory_space<vmem>>, %arg4: memref<1x48xf32, #tpu.memory_space<vmem>>, %arg5: memref<2x32xf32, #tpu.memory_space<vmem>>, %arg6: memref<2x16xf32, #tpu.memory_space<vmem>>) attributes {dimension_semantics = [#tpu.dimension_semantics<parallel>], iteration_bounds = array<i64: 1>, scalar_prefetch = 0 : i64, scratch_operands = 0 : i64, tpu.core_type = #tpu.core_type<tc>, window_params = [{transform_indices = @transform_0, window_bounds = array<i64: 2, 16, 32>}, {transform_indices = @transform_1, window_bounds = array<i64: 2, 48>}, {pipeline_mode = #tpu.pipeline_mode<synchronous>, transform_indices = @transform_2, window_bounds = array<i64: 32, 48>}, {pipeline_mode = #tpu.pipeline_mode<synchronous>, transform_indices = @transform_3, window_bounds = array<i64: 1, 48>}, {transform_indices = @transform_4, window_bounds = array<i64: 2, 32>}, {transform_indices = @transform_5, window_bounds = array<i64: 2, 16>}]} {
    %c0 = arith.constant 0 : index
    %c0_0 = arith.constant 0 : index
    %c0_1 = arith.constant 0 : index
    %0 = vector.load %arg1[%c0, %c0_0, %c0_1] : memref<2x16x32xbf16, #tpu.memory_space<vmem>>, vector<2x16x32xbf16>
    %1 = vector.shape_cast %0 : vector<2x16x32xbf16> to vector<32x32xbf16>
    %c0_2 = arith.constant 0 : index
    %c0_3 = arith.constant 0 : index
    %2 = vector.load %arg3[%c0_2, %c0_3] : memref<32x48xbf16, #tpu.memory_space<vmem>>, vector<32x48xbf16>
    %cst = arith.constant dense<0.000000e+00> : vector<32x48xf32>
    %3 = tpu.matmul %1, %2, %cst {dimension_numbers = #tpu.dot_dimension_numbers<[1], [0], [0], [1], [0, 0, 1, 1], [], []>} : vector<32x32xbf16>, vector<32x48xbf16>, vector<32x48xf32> -> vector<32x48xf32>
    %4 = vector.shape_cast %3 : vector<32x48xf32> to vector<2x16x48xf32>
    %c0_4 = arith.constant 0 : index
    %c0_5 = arith.constant 0 : index
    %5 = vector.load %arg2[%c0_4, %c0_5] : memref<2x48xf32, #tpu.memory_space<vmem>>, vector<2x48xf32>
    %6 = vector.shape_cast %5 : vector<2x48xf32> to vector<2x1x48xf32>
    %7 = vector.broadcast %6 : vector<2x1x48xf32> to vector<2x16x48xf32>
    %8 = arith.addf %4, %7 : vector<2x16x48xf32>
    %cst_6 = arith.constant 0.000000e+00 : f32
    %9 = vector.broadcast %cst_6 : f32 to vector<2x16x48xf32>
    %10 = arith.maximumf %8, %9 : vector<2x16x48xf32>
    %c0_7 = arith.constant 0 : index
    %c0_8 = arith.constant 0 : index
    %11 = vector.load %arg4[%c0_7, %c0_8] : memref<1x48xf32, #tpu.memory_space<vmem>>, vector<1x48xf32>
    %12 = vector.shape_cast %11 : vector<1x48xf32> to vector<1x1x48xf32>
    %13 = vector.broadcast %12 : vector<1x1x48xf32> to vector<2x16x48xf32>
    %14 = arith.mulf %10, %13 : vector<2x16x48xf32>
    %cst_9 = arith.constant dense<0.000000e+00> : vector<2x16xf32>
    %15 = vector.multi_reduction <add>, %14, %cst_9 [2] : vector<2x16x48xf32> to vector<2x16xf32>
    %16 = tpu.iota {dimensions = array<i32: 1>} : vector<2x16xi32>
    %c14_i32 = arith.constant 14 : i32
    %17 = vector.broadcast %c14_i32 : i32 to vector<2x16xi32>
    %18 = arith.cmpi slt, %16, %17 : vector<2x16xi32>
    %cst_10 = arith.constant 0xFF800000 : f32
    %19 = vector.broadcast %cst_10 : f32 to vector<2x16xf32>
    %20 = arith.select %18, %15, %19 : vector<2x16xi1>, vector<2x16xf32>
    %cst_11 = arith.constant dense<0xFF800000> : vector<2xf32>
    %21 = vector.multi_reduction <maximumf>, %20, %cst_11 [1] : vector<2x16xf32> to vector<2xf32>
    %22 = vector.shape_cast %21 : vector<2xf32> to vector<2x1xf32>
    %23 = vector.broadcast %22 : vector<2x1xf32> to vector<2x16xf32>
    %24 = arith.subf %20, %23 : vector<2x16xf32>
    %25 = math.exp %24 : vector<2x16xf32>
    %cst_12 = arith.constant dense<0.000000e+00> : vector<2xf32>
    %26 = vector.multi_reduction <add>, %25, %cst_12 [1] : vector<2x16xf32> to vector<2xf32>
    %27 = vector.shape_cast %26 : vector<2xf32> to vector<2x1xf32>
    %28 = tpu.reciprocal %27 {approx = true} : vector<2x1xf32> -> vector<2x1xf32>
    %29 = vector.broadcast %28 : vector<2x1xf32> to vector<2x16xf32>
    %30 = arith.mulf %25, %29 : vector<2x16xf32>
    %c0_13 = arith.constant 0 : index
    %c0_14 = arith.constant 0 : index
    %31 = vector.load %arg6[%c0_13, %c0_14] : memref<2x16xf32, #tpu.memory_space<vmem>>, vector<2x16xf32>
    tpu.vector_store %arg6[%c0_13, %c0_14], %30 {strides = array<i32>} : memref<2x16xf32, #tpu.memory_space<vmem>>, vector<2x16xf32>,
    %32 = arith.extf %0 : vector<2x16x32xbf16> to vector<2x16x32xf32>
    %33 = vector.shape_cast %30 : vector<2x16xf32> to vector<2x16x1xf32>
    %34 = vector.broadcast %33 : vector<2x16x1xf32> to vector<2x16x32xf32>
    %35 = arith.mulf %32, %34 : vector<2x16x32xf32>
    %cst_15 = arith.constant dense<0.000000e+00> : vector<2x32xf32>
    %36 = vector.multi_reduction <add>, %35, %cst_15 [1] : vector<2x16x32xf32> to vector<2x32xf32>
    %c0_16 = arith.constant 0 : index
    %c0_17 = arith.constant 0 : index
    %37 = vector.load %arg5[%c0_16, %c0_17] : memref<2x32xf32, #tpu.memory_space<vmem>>, vector<2x32xf32>
    tpu.vector_store %arg5[%c0_16, %c0_17], %36 {strides = array<i32>} : memref<2x32xf32, #tpu.memory_space<vmem>>, vector<2x32xf32>,
    return
  }
  func.func @transform_0(%arg0: i32) -> (i32, i32, i32) {
    %c0_i32 = arith.constant 0 : i32
    %c0_i32_0 = arith.constant 0 : i32
    %c0_i32_1 = arith.constant 0 : i32
    return %arg0, %c0_i32, %c0_i32_0 : i32, i32, i32
  }
  func.func @transform_1(%arg0: i32) -> (i32, i32) {
    %c0_i32 = arith.constant 0 : i32
    %c0_i32_0 = arith.constant 0 : i32
    return %arg0, %c0_i32 : i32, i32
  }
  func.func @transform_2(%arg0: i32) -> (i32, i32) {
    %c0_i32 = arith.constant 0 : i32
    %c0_i32_0 = arith.constant 0 : i32
    %c0_i32_1 = arith.constant 0 : i32
    return %c0_i32, %c0_i32_0 : i32, i32
  }
  func.func @transform_3(%arg0: i32) -> (i32, i32) {
    %c0_i32 = arith.constant 0 : i32
    %c0_i32_0 = arith.constant 0 : i32
    %c0_i32_1 = arith.constant 0 : i32
    return %c0_i32, %c0_i32_0 : i32, i32
  }
  func.func @transform_4(%arg0: i32) -> (i32, i32) {
    %c0_i32 = arith.constant 0 : i32
    %c0_i32_0 = arith.constant 0 : i32
    return %arg0, %c0_i32 : i32, i32
  }
  func.func @transform_5(%arg0: i32) -> (i32, i32) {
    %c0_i32 = arith.constant 0 : i32
    %c0_i32_0 = arith.constant 0 : i32
    return %arg0, %c0_i32 : i32, i32
  }
}

</mosaic_0001>

<bundles_post_ra>
// kernel: tpu_custom_call.1
= control target key start
LH: loop header
LB: loop body
LE: loop exit
PB: predicated region body
PF: predicated region fallthrough
CT: control target
= control target key end

     0   :  { %11 = vsyncpa [#allocation3], 0  ;;  %s686_s0 = inlined_call_operand.hbm [shape: bf16[2,16,32], index: 0, kind: input, shape index: {}]   ;;  %s687_s1 = inlined_call_operand.hbm [shape: f32[2,48], index: 1, kind: input, shape index: {}]   ;;  %s688_s2 = inlined_call_operand.hbm [shape: bf16[32,48], index: 2, kind: input, shape index: {}]   ;;  %s689_s3 = inlined_call_operand.hbm [shape: f32[1,48], index: 3, kind: input, shape index: {}]   ;;  %s690_s4 = inlined_call_operand.hbm [shape: f32[2,32], index: 4, kind: output, shape index: {0}]   ;;  %s691_s5 = inlined_call_operand.hbm [shape: f32[2,16], index: 5, kind: output, shape index: {1}]  }
   0x1   :  { %12 = vsyncpa [#allocation6], 0 }
   0x2   :  { %13 = vsyncpa [#allocation9], 0 }
   0x3   :  { %14 = vsyncpa [#allocation4], 0 }
   0x4   :  { %15 = vsyncpa [#allocation12], 0  ;;  %s535_s18 = smov [#allocation5]   ;;  %s536_s20 = smov [#allocation2]  }
   0x5   :  { %s34_s19 = sshll.u32 %s535_s18, 4  ;;  %s21_s21 = sshll.u32 %s536_s20, 4  ;;  %s35_s19 = int_to_ptr.vmem [resolvable:$true] %s34_s19  ;;  %s574_s21 = int_to_ptr.vmem [resolvable:$true] %s21_s21 }
   0x6   :  { %s393_s24 = scalar_lea.hbm %s687_s1, 32 }
   0x7   :  { %p394_p0 = scmp.ne.s32.totalorder %s687_s1, %s393_s24  ;;  %p397_p1 = scmp.lt.u32.totalorder %s393_s24, %s687_s1 }
   0x9   :  { %p399_p2 = pnand %p397_p1, %p394_p0 }
   0xb   :  { %402 = shalt.err (!%p399_p2)
}
   0xc   :  { %s403_s29 = scalar_lea.vmem %s35_s19, 32  ;;  %p408_p4 = scmp.lt.s32.totalorder %s35_s19, %s35_s19 }
   0xd   :  { %p404_p3 = scmp.ne.s32.totalorder %s35_s19, %s403_s29  ;;  %p409_p5 = scmp.lt.s32.totalorder %s403_s29, %s403_s29 }
   0xf   :  { %p410_p6 = por %p409_p5, %p408_p4 }
  0x11   :  { %p411_p7 = pnand %p410_p6, %p404_p3 }
  0x13   :  { %414 = shalt.err (!%p411_p7)
}
  0x14   :  { %37 = dma.hbm_to_vmem [thread:$0]  %s687_s1, 32, %s35_s19, [#allocation6]  }
  0x15   :  { %s415_s9 = scalar_lea.hbm %s686_s0, 256 }
  0x16   :  { %p416_p8 = scmp.ne.s32.totalorder %s686_s0, %s415_s9  ;;  %p419_p9 = scmp.lt.u32.totalorder %s415_s9, %s686_s0 }
  0x18   :  { %p421_p10 = pnand %p419_p9, %p416_p8 }
  0x1a   :  { %424 = shalt.err (!%p421_p10)
}
  0x1b   :  { %s425_s14 = scalar_lea.vmem %s574_s21, 256  ;;  %p430_p12 = scmp.lt.s32.totalorder %s574_s21, %s574_s21 }
  0x1c   :  { %p426_p11 = scmp.ne.s32.totalorder %s574_s21, %s425_s14  ;;  %p431_p13 = scmp.lt.s32.totalorder %s425_s14, %s425_s14 }
  0x1e   :  { %p432_p0 = por %p431_p13, %p430_p12 }
  0x20   :  { %p433_p1 = pnand %p432_p0, %p426_p11 }
  0x22   :  { %436 = shalt.err (!%p433_p1)
}
  0x23   :  { %s537_s1 = smov 64   ;;  %s538_s15 = smov 4  }
  0x24   :  { %27 = dma.hbm_to_vmem [thread:$0]  %s686_s0, 256, %s574_s21, [#allocation3], %s537_s1, %s537_s1, %s538_s15  }
  0x25   :  { %s539_s18 = smov [#allocation7]   ;;  %s540_s20 = smov [#allocation8]  }
  0x26   :  { %s43_s19 = sshll.u32 %s539_s18, 4  ;;  %s56_s22 = sshll.u32 %s540_s20, 4  ;;  %s44_s19 = int_to_ptr.vmem [resolvable:$true] %s43_s19  ;;  %s57_s22 = int_to_ptr.vmem [resolvable:$true] %s56_s22 }
  0x27   :  { %s437_s25 = scalar_lea.hbm %s688_s2, 256 }
  0x28   :  { %p438_p2 = scmp.ne.s32.totalorder %s688_s2, %s437_s25  ;;  %p441_p3 = scmp.lt.u32.totalorder %s437_s25, %s688_s2 }
  0x2a   :  { %p443_p4 = pnand %p441_p3, %p438_p2 }
  0x2c   :  { %446 = shalt.err (!%p443_p4)
}
  0x2d   :  { %s447_s0 = scalar_lea.vmem %s44_s19, 256  ;;  %p452_p6 = scmp.lt.s32.totalorder %s44_s19, %s44_s19 }
  0x2e   :  { %p448_p5 = scmp.ne.s32.totalorder %s44_s19, %s447_s0  ;;  %p453_p7 = scmp.lt.s32.totalorder %s447_s0, %s447_s0 }
  0x30   :  { %p454_p8 = por %p453_p7, %p452_p6 }
  0x32   :  { %p455_p9 = pnand %p454_p8, %p448_p5 }
  0x34   :  { %458 = shalt.err (!%p455_p9)
}
  0x35   :  { %49 = dma.hbm_to_vmem [thread:$0]  %s688_s2, 256, %s44_s19, [#allocation6], %s537_s1, %s537_s1, %s538_s15  }
  0x36   :  { %s459_s8 = scalar_lea.hbm %s689_s3, 16 }
  0x37   :  { %p460_p10 = scmp.ne.s32.totalorder %s689_s3, %s459_s8  ;;  %p463_p11 = scmp.lt.u32.totalorder %s459_s8, %s689_s3 }
  0x39   :  { %p465_p12 = pnand %p463_p11, %p460_p10 }
  0x3b   :  { %468 = shalt.err (!%p465_p12)
}
  0x3c   :  { %s469_s13 = scalar_lea.vmem %s57_s22, 16  ;;  %s473_s14 = scalar_lea.vmem %s57_s22, 32 }
  0x3d   :  { %p470_p13 = scmp.ne.s32.totalorder %s57_s22, %s469_s13  ;;  %p474_p0 = scmp.lt.s32.totalorder %s57_s22, %s57_s22 }
  0x3e   :  { %p475_p1 = scmp.lt.s32.totalorder %s473_s14, %s469_s13 }
  0x40   :  { %p476_p2 = por %p475_p1, %p474_p0 }
  0x42   :  { %p477_p3 = pnand %p476_p2, %p470_p13 }
  0x44   :  { %480 = shalt.err (!%p477_p3)
}
  0x45   :  { %59 = dma.hbm_to_vmem [thread:$0]  %s689_s3, 16, %s57_s22, [#allocation9]  }
  0x46   :  { %525 = dma.done.wait [#allocation3], 256  }
  0x47   :  { %526 = vsyncadd [#allocation3], 4294967040 }
  0x48   :  { %527 = dma.done.wait [#allocation6], 288  }
  0x49   :  { %528 = vsyncadd [#allocation6], 4294967008 }
  0x4a   :  { %529 = dma.done.wait [#allocation9], 16  }
  0x4b   :  { %530 = vsyncadd [#allocation9], 4294967280  ;;  %v383_v0 = vld [vmem:[#allocation7] sm:$0xff]   ;;  %v384_v1 = vld [vmem:[#allocation7 + $0x8] sm:$0xff]   ;;  %vm103_vm0 = vcmask 261120   ;;  %v172_v6 = vlaneseq  ;;  %vm212_vm1 = vcmask 392192  }
  0x4c   :  { %366 = vmatprep.subr.bf16.mxu0 %v383_v0  ;;  %v629_v2 = vld [vmem:[#allocation2] sm:$0xff]   ;;  %v631_v3 = vld [vmem:[#allocation2 + $0x8] sm:$0xff]   ;;  %v541_v4 = vmov 1966171168   ;;  %vm241_vm2 = vcmask 130112   ;;  %vm252_vm3 = vcmask 1041409  }
  0x4d   :  { %367 = vmatpush3.bf16.msra.mxu0 %v383_v0  ;;  %370 = vmatprep.mubr.msk.bf16.mxu0 %vm103_vm0, %v629_v2  ;;  %v170_v5 = vunpack.c.l.s4 %v541_v4  ;;  %v637_v8 = vshrl.u32 %v172_v6, 7  ;;  %v360_v9 = vld.sshfl [vmem:[#allocation5] sm:$0x11 pattern:$0x75316420]  ;;  %v226_v38 = vand.u32 127, %v172_v6 }
  0x4e   :  { %368 = vmatprep.subr.bf16.mxu0 %v384_v1  ;;  %v168_v10 = vcombine.high %v360_v9, %v360_v9  ;;  %v361_v22 = vld [vmem:[#allocation8] ss:$0 sm:$0xff]  ;;  %vm256_vm5 = vcmask 123904   ;;  %s542_s3 = smov [#allocation11]  }
  0x4f   :  { %v171_v7 = vunpack.c.0.s8 %v170_v5  ;;  %v641_v13 = vsub.s32 0, %v637_v8  ;;  %v236_v39 = vadd.s32 4294967288, %v226_v38  ;;  %v234_v41 = vsub.s32 %v226_v38, %v637_v8  ;;  %s339_s15 = sshll.u32 %s542_s3, 4  ;;  %s340_s15 = int_to_ptr.vmem [resolvable:$true] %s339_s15 }
  0x50   :  { %vm227_vm4 = vcmp.lt.s32.totalorder %v226_v38, 14  ;;  %v286_v0 = vsub.s32 1, %v637_v8  ;;  %s481_s16 = scalar_lea.vmem %s340_s15, 32  ;;  %p486_p5 = scmp.lt.s32.totalorder %s340_s15, %s340_s15 }
  0x51   :  { %369 = vmatpush3.bf16.msra.mxu0 %v384_v1  ;;  %v174_v11 = vsub.s32 %v171_v7, %v637_v8  ;;  %v239_v43 = vsub.s32 %v236_v39, %v637_v8  ;;  %p482_p4 = scmp.ne.s32.totalorder %s340_s15, %s481_s16  ;;  %p487_p6 = scmp.lt.s32.totalorder %s481_s16, %s481_s16 }
  0x53   :  { %v182_v12 = vrot.slane %v168_v10, %v174_v11  ;;  %v175_v14 = vrot.slane %v360_v9, %v174_v11  ;;  %p488_p7 = por %p487_p6, %p486_p5 }
  0x54   :  { %371 = vmatmul.mubr.msk.bf16.vlgmr.msra.gmra.mrb[0].mxu0 %vm103_vm0, %v631_v3 }
  0x55   :  { %v190_v15 = vrot.slane %v182_v12, %v641_v13  ;;  %v186_v16 = vrot.slane %v175_v14, %v641_v13  ;;  %p489_p8 = pnand %p488_p7, %p482_p4 }
 0x127   :  { %v372_v17 = vpop.f32.mrb[0].mxu0 }
 0x128   :  { %v195_v18 = vadd.f32 %v372_v17, %v190_v15  ;;  %v144_v19 = vpop.f32.mrb[1].mxu0 }
 0x129   :  { %v193_v20 = vadd.f32 %v186_v16, %v144_v19  ;;  %v373_v21 = vpop.f32.mrb[2].mxu0 }
 0x12a   :  { %v199_v23 = vmax.f32 %v195_v18, 0.0  ;;  %v196_v24 = vadd.f32 %v373_v21, %v190_v15  ;;  %v147_v25 = vpop.f32.mrb[3].mxu0 }
 0x12b   :  { %v197_v26 = vmax.f32 %v193_v20, 0.0  ;;  %v194_v27 = vadd.f32 %v186_v16, %v147_v25 }
 0x12c   :  { %v200_v28 = vmax.f32 %v196_v24, 0.0  ;;  %v210_v29 = vmul.f32 %v361_v22, %v199_v23 }
 0x12d   :  { %v198_v30 = vmax.f32 %v194_v27, 0.0  ;;  %v208_v31 = vmul.f32 %v361_v22, %v197_v26 }
 0x12e   :  { %v219_v32 = vsel %vm212_vm1, %v210_v29, 0.0  ;;  %v211_v33 = vmul.f32 %v361_v22, %v200_v28 }
 0x12f   :  { %220 = vadd.xlane.f32.xlu1 %v219_v32  ;;  %v213_v34 = vsel %vm212_vm1, %v208_v31, 0.0  ;;  %v209_v35 = vmul.f32 %v361_v22, %v198_v30 }
 0x130   :  { %214 = vadd.xlane.f32.xlu0 %v213_v34  ;;  %v222_v36 = vsel %vm212_vm1, %v211_v33, 0.0 }
 0x131   :  { %v216_v37 = vsel %vm212_vm1, %v209_v35, 0.0 }
 0x133   :  { %223 = vadd.xlane.f32.xlu1 %v222_v36 }
 0x134   :  { %217 = vadd.xlane.f32.xlu0 %v216_v37 }
 0x1bc   :  { %v221_v40 = vpop.xlane.xlu1 %220 }
 0x1bd   :  { %v215_v42 = vpop.xlane.xlu0 %214  ;;  %v246_v45 = vrot.slane %v221_v40, %v234_v41 }
 0x1be   :  { %v235_v48 = vrot.slane %v215_v42, %v234_v41 }
 0x1c0   :  { %v224_v44 = vpop.xlane.xlu1 %223 }
 0x1c1   :  { %v250_v46 = vrot.slane %v224_v44, %v239_v43  ;;  %v218_v47 = vpop.xlane.xlu0 %217 }
 0x1c2   :  { %v240_v49 = vrot.slane %v218_v47, %v239_v43 }
 0x1c3   :  { %v251_v50 = vsel %vm241_vm2, %v250_v46, %v246_v45 }
 0x1c4   :  { %v242_v51 = vsel %vm241_vm2, %v240_v49, %v235_v48 }
 0x1c5   :  { %v253_v52 = vsel %vm252_vm3, %v251_v50, %v242_v51 }
 0x1c6   :  { %v255_v53 = vsel %vm227_vm4, %v253_v52, -inf }
 0x1c7   :  { %v257_v54 = vsel %vm256_vm5, %v255_v53, -inf }
 0x1c8   :  { %258 = vmax.xlane.f32.xlu0 %v257_v54 }
 0x255   :  { %v259_v55 = vpop.xlane.xlu0 %258 }
 0x256   :  { %v260_v56 = vsub.f32 %v255_v53, %v259_v55 }
 0x258   :  { %v261_v57 = vmul.f32 1.442695, %v260_v56 }
 0x25a   :  { %389 = vpow2.f32 %v261_v57 }
 0x264   :  { %v390_v58 = vpop.eup %389 }
 0x265   :  { %v263_v59 = vsel %vm256_vm5, %v390_v58, 0.0 }
 0x266   :  { %264 = vadd.xlane.f32.xlu1 %v263_v59 }
 0x2f3   :  { %v265_v60 = vpop.xlane.xlu1 %264 }
 0x2f4   :  { %391 = vrcp.f32 %v265_v60 }
 0x2fe   :  { %v392_v61 = vpop.eup %391 }
 0x2ff   :  { %v267_v62 = vmul.f32 %v392_v61, %v390_v58 }
 0x301   :  { %v276_v63 = vrot.slane %v267_v62, %v641_v13  ;;  %268 = vst.msk [vmem:[#allocation11] sm:$0x3] %vm256_vm5, %v267_v62  ;;  %v287_v1 = vrot.slane %v267_v62, %v286_v0 }
 0x303   :  { %282 = vbcast.lane.b32.xlu1 %v276_v63, 264  ;;  %278 = vbcast.lane.b32.xlu0 %v276_v63, 256 }
 0x307   :  { %289 = vbcast.lane.b32.xlu1 %v287_v1, 256 }
 0x30b   :  { %293 = vbcast.lane.b32.xlu1 %v287_v1, 264 }
 0x30c   :  { %492 = shalt.err (!%p489_p8)
}
 0x30d   :  { %s493_s19 = scalar_lea.hbm %s691_s5, 32 }
 0x30e   :  { %p494_p9 = scmp.ne.s32.totalorder %s691_s5, %s493_s19  ;;  %p497_p10 = scmp.lt.u32.totalorder %s493_s19, %s691_s5 }
 0x310   :  { %p499_p11 = pnand %p497_p10, %p494_p9 }
 0x312   :  { %502 = shalt.err (!%p499_p11)
}
 0x313   :  { %342 = dma.vmem_to_hbm [thread:$0]  %s340_s15, 32, %s691_s5, [#allocation12]   ;;  %v270_v4 = vunpack.c.h.bf16 %v629_v2  ;;  %v269_v5 = vunpack.c.l.bf16 %v629_v2  ;;  %v271_v12 = vunpack.c.l.bf16 %v631_v3  ;;  %v272_v15 = vunpack.c.h.bf16 %v631_v3 }
 0x314   :  { %s543_s5 = smov [#allocation10]   ;;  %vm321_vm6 = vcmask 254976  }
 0x315   :  { %s329_s27 = sshll.u32 %s543_s5, 4  ;;  %s330_s27 = int_to_ptr.vmem [resolvable:$true] %s329_s27 }
 0x316   :  { %s503_s28 = scalar_lea.vmem %s330_s27, 32  ;;  %p508_p13 = scmp.lt.s32.totalorder %s330_s27, %s330_s27 }
 0x317   :  { %p504_p12 = scmp.ne.s32.totalorder %s330_s27, %s503_s28  ;;  %p509_p0 = scmp.lt.s32.totalorder %s503_s28, %s503_s28 }
 0x319   :  { %p510_p1 = por %p509_p0, %p508_p13 }
 0x31b   :  { %p511_p2 = pnand %p510_p1, %p504_p12 }
 0x375   :  { %v283_v6 = vpop.permute.xlu1 %282  ;;  %v279_v7 = vpop.permute.xlu0 %278 }
 0x376   :  { %v296_v8 = vmul.f32 %v283_v6, %v270_v4  ;;  %v295_v9 = vmul.f32 %v279_v7, %v269_v5 }
 0x378   :  { %v300_v10 = vsel %vm103_vm0, %v296_v8, 0.0  ;;  %v299_v11 = vsel %vm103_vm0, %v295_v9, 0.0 }
 0x379   :  { %v301_v13 = vadd.f32 %v300_v10, %v299_v11  ;;  %v290_v14 = vpop.permute.xlu1 %289 }
 0x37a   :  { %v297_v17 = vmul.f32 %v290_v14, %v271_v12 }
 0x37b   :  { %v302_v16 = vrot.slane %v301_v13, 4 }
 0x37c   :  { %v308_v2 = vsel %vm103_vm0, %v297_v17, 0.0 }
 0x37d   :  { %v303_v18 = vadd.f32 %v302_v16, %v301_v13  ;;  %v294_v19 = vpop.permute.xlu1 %293 }
 0x37e   :  { %v298_v20 = vmul.f32 %v294_v19, %v272_v15 }
 0x37f   :  { %v304_v22 = vrot.slane %v303_v18, 2 }
 0x380   :  { %v309_v21 = vsel %vm103_vm0, %v298_v20, 0.0 }
 0x381   :  { %v310_v23 = vadd.f32 %v309_v21, %v308_v2  ;;  %v305_v25 = vadd.f32 %v304_v22, %v303_v18 }
 0x383   :  { %v311_v24 = vrot.slane %v310_v23, 4  ;;  %v306_v28 = vrot.slane %v305_v25, 1 }
 0x385   :  { %v312_v26 = vadd.f32 %v311_v24, %v310_v23  ;;  %v307_v3 = vadd.f32 %v306_v28, %v305_v25 }
 0x387   :  { %v313_v27 = vrot.slane %v312_v26, 2 }
 0x389   :  { %v314_v29 = vadd.f32 %v313_v27, %v312_v26 }
 0x38b   :  { %v315_v30 = vrot.slane %v314_v29, 1 }
 0x38d   :  { %v316_v31 = vadd.f32 %v315_v30, %v314_v29 }
 0x38f   :  { %v319_v32 = vsel %vm252_vm3, %v316_v31, %v307_v3 }
 0x390   :  { %322 = vst.msk [vmem:[#allocation10] sm:$0x3] %vm321_vm6, %v319_v32 }
 0x391   :  { %514 = shalt.err (!%p511_p2)
}
 0x392   :  { %s515_s21 = scalar_lea.hbm %s690_s4, 32 }
 0x393   :  { %p516_p3 = scmp.ne.s32.totalorder %s690_s4, %s515_s21  ;;  %p519_p4 = scmp.lt.u32.totalorder %s515_s21, %s690_s4 }
 0x395   :  { %p521_p5 = pnand %p519_p4, %p516_p3 }
 0x397   :  { %524 = shalt.err (!%p521_p5)
}
 0x398   :  { %332 = dma.vmem_to_hbm [thread:$0]  %s330_s27, 32, %s690_s4, [#allocation4]  }
 0x399   :  { %531 = dma.done.wait [#allocation4], 32  }
 0x39a   :  { %532 = vsyncadd [#allocation4], 4294967264 }
 0x39b   :  { %533 = dma.done.wait [#allocation12], 32  }
 0x39c   :  { %534 = vsyncadd [#allocation12], 4294967264 }
 0x39d   :  { %349 = vsyncpa [#allocation3], 1 }
 0x39e   :  { %350 = vsyncpa [#allocation6], 1 }
 0x39f   :  { %351 = vsyncpa [#allocation9], 1 }
 0x3a0   :  { %352 = vsyncpa [#allocation4], 1 }
 0x3a1   :  { %353 = vsyncpa [#allocation12], 1 }

// kernel: tpu_custom_call.1
= control target key start
LH: loop header
LB: loop body
LE: loop exit
PB: predicated region body
PF: predicated region fallthrough
CT: control target
= control target key end

     0   :  { %11 = vsyncpa [#allocation3], 0  ;;  %s686_s0 = inlined_call_operand.hbm [shape: bf16[2,16,32], index: 0, kind: input, shape index: {}]   ;;  %s687_s1 = inlined_call_operand.hbm [shape: f32[2,48], index: 1, kind: input, shape index: {}]   ;;  %s688_s2 = inlined_call_operand.hbm [shape: bf16[32,48], index: 2, kind: input, shape index: {}]   ;;  %s689_s3 = inlined_call_operand.hbm [shape: f32[1,48], index: 3, kind: input, shape index: {}]   ;;  %s690_s4 = inlined_call_operand.hbm [shape: f32[2,32], index: 4, kind: output, shape index: {0}]   ;;  %s691_s5 = inlined_call_operand.hbm [shape: f32[2,16], index: 5, kind: output, shape index: {1}]  }
   0x1   :  { %12 = vsyncpa [#allocation6], 0 }
   0x2   :  { %13 = vsyncpa [#allocation9], 0 }
   0x3   :  { %14 = vsyncpa [#allocation4], 0 }
   0x4   :  { %15 = vsyncpa [#allocation12], 0  ;;  %s535_s18 = smov [#allocation5]   ;;  %s536_s20 = smov [#allocation2]  }
   0x5   :  { %s34_s19 = sshll.u32 %s535_s18, 4  ;;  %s21_s21 = sshll.u32 %s536_s20, 4  ;;  %s35_s19 = int_to_ptr.vmem [resolvable:$true] %s34_s19  ;;  %s574_s21 = int_to_ptr.vmem [resolvable:$true] %s21_s21 }
   0x6   :  { %s393_s24 = scalar_lea.hbm %s687_s1, 32 }
   0x7   :  { %p394_p0 = scmp.ne.s32.totalorder %s687_s1, %s393_s24  ;;  %p397_p1 = scmp.lt.u32.totalorder %s393_s24, %s687_s1 }
   0x9   :  { %p399_p2 = pnand %p397_p1, %p394_p0 }
   0xb   :  { %402 = shalt.err (!%p399_p2)
}
   0xc   :  { %s403_s29 = scalar_lea.vmem %s35_s19, 32  ;;  %p408_p4 = scmp.lt.s32.totalorder %s35_s19, %s35_s19 }
   0xd   :  { %p404_p3 = scmp.ne.s32.totalorder %s35_s19, %s403_s29  ;;  %p409_p5 = scmp.lt.s32.totalorder %s403_s29, %s403_s29 }
   0xf   :  { %p410_p6 = por %p409_p5, %p408_p4 }
  0x11   :  { %p411_p7 = pnand %p410_p6, %p404_p3 }
  0x13   :  { %414 = shalt.err (!%p411_p7)
}
  0x14   :  { %37 = dma.hbm_to_vmem [thread:$0]  %s687_s1, 32, %s35_s19, [#allocation6]  }
  0x15   :  { %s415_s9 = scalar_lea.hbm %s686_s0, 256 }
  0x16   :  { %p416_p8 = scmp.ne.s32.totalorder %s686_s0, %s415_s9  ;;  %p419_p9 = scmp.lt.u32.totalorder %s415_s9, %s686_s0 }
  0x18   :  { %p421_p10 = pnand %p419_p9, %p416_p8 }
  0x1a   :  { %424 = shalt.err (!%p421_p10)
}
  0x1b   :  { %s425_s14 = scalar_lea.vmem %s574_s21, 256  ;;  %p430_p12 = scmp.lt.s32.totalorder %s574_s21, %s574_s21 }
  0x1c   :  { %p426_p11 = scmp.ne.s32.totalorder %s574_s21, %s425_s14  ;;  %p431_p13 = scmp.lt.s32.totalorder %s425_s14, %s425_s14 }
  0x1e   :  { %p432_p0 = por %p431_p13, %p430_p12 }
  0x20   :  { %p433_p1 = pnand %p432_p0, %p426_p11 }
  0x22   :  { %436 = shalt.err (!%p433_p1)
}
  0x23   :  { %s537_s1 = smov 64   ;;  %s538_s15 = smov 4  }
  0x24   :  { %27 = dma.hbm_to_vmem [thread:$0]  %s686_s0, 256, %s574_s21, [#allocation3], %s537_s1, %s537_s1, %s538_s15  }
  0x25   :  { %s539_s18 = smov [#allocation7]   ;;  %s540_s20 = smov [#allocation8]  }
  0x26   :  { %s43_s19 = sshll.u32 %s539_s18, 4  ;;  %s56_s22 = sshll.u32 %s540_s20, 4  ;;  %s44_s19 = int_to_ptr.vmem [resolvable:$true] %s43_s19  ;;  %s57_s22 = int_to_ptr.vmem [resolvable:$true] %s56_s22 }
  0x27   :  { %s437_s25 = scalar_lea.hbm %s688_s2, 256 }
  0x28   :  { %p438_p2 = scmp.ne.s32.totalorder %s688_s2, %s437_s25  ;;  %p441_p3 = scmp.lt.u32.totalorder %s437_s25, %s688_s2 }
  0x2a   :  { %p443_p4 = pnand %p441_p3, %p438_p2 }
  0x2c   :  { %446 = shalt.err (!%p443_p4)
}
  0x2d   :  { %s447_s0 = scalar_lea.vmem %s44_s19, 256  ;;  %p452_p6 = scmp.lt.s32.totalorder %s44_s19, %s44_s19 }
  0x2e   :  { %p448_p5 = scmp.ne.s32.totalorder %s44_s19, %s447_s0  ;;  %p453_p7 = scmp.lt.s32.totalorder %s447_s0, %s447_s0 }
  0x30   :  { %p454_p8 = por %p453_p7, %p452_p6 }
  0x32   :  { %p455_p9 = pnand %p454_p8, %p448_p5 }
  0x34   :  { %458 = shalt.err (!%p455_p9)
}
  0x35   :  { %49 = dma.hbm_to_vmem [thread:$0]  %s688_s2, 256, %s44_s19, [#allocation6], %s537_s1, %s537_s1, %s538_s15  }
  0x36   :  { %s459_s8 = scalar_lea.hbm %s689_s3, 16 }
  0x37   :  { %p460_p10 = scmp.ne.s32.totalorder %s689_s3, %s459_s8  ;;  %p463_p11 = scmp.lt.u32.totalorder %s459_s8, %s689_s3 }
  0x39   :  { %p465_p12 = pnand %p463_p11, %p460_p10 }
  0x3b   :  { %468 = shalt.err (!%p465_p12)
}
  0x3c   :  { %s469_s13 = scalar_lea.vmem %s57_s22, 16  ;;  %s473_s14 = scalar_lea.vmem %s57_s22, 32 }
  0x3d   :  { %p470_p13 = scmp.ne.s32.totalorder %s57_s22, %s469_s13  ;;  %p474_p0 = scmp.lt.s32.totalorder %s57_s22, %s57_s22 }
  0x3e   :  { %p475_p1 = scmp.lt.s32.totalorder %s473_s14, %s469_s13 }
  0x40   :  { %p476_p2 = por %p475_p1, %p474_p0 }
  0x42   :  { %p477_p3 = pnand %p476_p2, %p470_p13 }
  0x44   :  { %480 = shalt.err (!%p477_p3)
}
  0x45   :  { %59 = dma.hbm_to_vmem [thread:$0]  %s689_s3, 16, %s57_s22, [#allocation9]  }
  0x46   :  { %525 = dma.done.wait [#allocation3], 256  }
  0x47   :  { %526 = vsyncadd [#allocation3], 4294967040 }
  0x48   :  { %527 = dma.done.wait [#allocation6], 288  }
  0x49   :  { %528 = vsyncadd [#allocation6], 4294967008 }
  0x4a   :  { %529 = dma.done.wait [#allocation9], 16  }
  0x4b   :  { %530 = vsyncadd [#allocation9], 4294967280  ;;  %v383_v0 = vld [vmem:[#allocation7] sm:$0xff]   ;;  %v384_v1 = vld [vmem:[#allocation7 + $0x8] sm:$0xff]   ;;  %vm103_vm0 = vcmask 261120   ;;  %v172_v6 = vlaneseq  ;;  %vm212_vm1 = vcmask 392192  }
  0x4c   :  { %366 = vmatprep.subr.bf16.mxu0 %v383_v0  ;;  %v629_v2 = vld [vmem:[#allocation2] sm:$0xff]   ;;  %v631_v3 = vld [vmem:[#allocation2 + $0x8] sm:$0xff]   ;;  %v541_v4 = vmov 1966171168   ;;  %vm241_vm2 = vcmask 130112   ;;  %vm252_vm3 = vcmask 1041409  }
  0x4d   :  { %367 = vmatpush3.bf16.msra.mxu0 %v383_v0  ;;  %370 = vmatprep.mubr.msk.bf16.mxu0 %vm103_vm0, %v629_v2  ;;  %v170_v5 = vunpack.c.l.s4 %v541_v4  ;;  %v637_v8 = vshrl.u32 %v172_v6, 7  ;;  %v360_v9 = vld.sshfl [vmem:[#allocation5] sm:$0x11 pattern:$0x75316420]  ;;  %v226_v38 = vand.u32 127, %v172_v6 }
  0x4e   :  { %368 = vmatprep.subr.bf16.mxu0 %v384_v1  ;;  %v168_v10 = vcombine.high %v360_v9, %v360_v9  ;;  %v361_v22 = vld [vmem:[#allocation8] ss:$0 sm:$0xff]  ;;  %vm256_vm5 = vcmask 123904   ;;  %s542_s3 = smov [#allocation11]  }
  0x4f   :  { %v171_v7 = vunpack.c.0.s8 %v170_v5  ;;  %v641_v13 = vsub.s32 0, %v637_v8  ;;  %v236_v39 = vadd.s32 4294967288, %v226_v38  ;;  %v234_v41 = vsub.s32 %v226_v38, %v637_v8  ;;  %s339_s15 = sshll.u32 %s542_s3, 4  ;;  %s340_s15 = int_to_ptr.vmem [resolvable:$true] %s339_s15 }
  0x50   :  { %vm227_vm4 = vcmp.lt.s32.totalorder %v226_v38, 14  ;;  %v286_v0 = vsub.s32 1, %v637_v8  ;;  %s481_s16 = scalar_lea.vmem %s340_s15, 32  ;;  %p486_p5 = scmp.lt.s32.totalorder %s340_s15, %s340_s15 }
  0x51   :  { %369 = vmatpush3.bf16.msra.mxu0 %v384_v1  ;;  %v174_v11 = vsub.s32 %v171_v7, %v637_v8  ;;  %v239_v43 = vsub.s32 %v236_v39, %v637_v8  ;;  %p482_p4 = scmp.ne.s32.totalorder %s340_s15, %s481_s16  ;;  %p487_p6 = scmp.lt.s32.totalorder %s481_s16, %s481_s16 }
  0x53   :  { %v182_v12 = vrot.slane %v168_v10, %v174_v11  ;;  %v175_v14 = vrot.slane %v360_v9, %v174_v11  ;;  %p488_p7 = por %p487_p6, %p486_p5 }
  0x54   :  { %371 = vmatmul.mubr.msk.bf16.vlgmr.msra.gmra.mrb[0].mxu0 %vm103_vm0, %v631_v3 }
  0x55   :  { %v190_v15 = vrot.slane %v182_v12, %v641_v13  ;;  %v186_v16 = vrot.slane %v175_v14, %v641_v13  ;;  %p489_p8 = pnand %p488_p7, %p482_p4 }
 0x127   :  { %v372_v17 = vpop.f32.mrb[0].mxu0 }
 0x128   :  { %v195_v18 = vadd.f32 %v372_v17, %v190_v15  ;;  %v144_v19 = vpop.f32.mrb[1].mxu0 }
 0x129   :  { %v193_v20 = vadd.f32 %v186_v16, %v144_v19  ;;  %v373_v21 = vpop.f32.mrb[2].mxu0 }
 0x12a   :  { %v199_v23 = vmax.f32 %v195_v18, 0.0  ;;  %v196_v24 = vadd.f32 %v373_v21, %v190_v15  ;;  %v147_v25 = vpop.f32.mrb[3].mxu0 }
 0x12b   :  { %v197_v26 = vmax.f32 %v193_v20, 0.0  ;;  %v194_v27 = vadd.f32 %v186_v16, %v147_v25 }
 0x12c   :  { %v200_v28 = vmax.f32 %v196_v24, 0.0  ;;  %v210_v29 = vmul.f32 %v361_v22, %v199_v23 }
 0x12d   :  { %v198_v30 = vmax.f32 %v194_v27, 0.0  ;;  %v208_v31 = vmul.f32 %v361_v22, %v197_v26 }
 0x12e   :  { %v219_v32 = vsel %vm212_vm1, %v210_v29, 0.0  ;;  %v211_v33 = vmul.f32 %v361_v22, %v200_v28 }
 0x12f   :  { %220 = vadd.xlane.f32.xlu1 %v219_v32  ;;  %v213_v34 = vsel %vm212_vm1, %v208_v31, 0.0  ;;  %v209_v35 = vmul.f32 %v361_v22, %v198_v30 }
 0x130   :  { %214 = vadd.xlane.f32.xlu0 %v213_v34  ;;  %v222_v36 = vsel %vm212_vm1, %v211_v33, 0.0 }
 0x131   :  { %v216_v37 = vsel %vm212_vm1, %v209_v35, 0.0 }
 0x133   :  { %223 = vadd.xlane.f32.xlu1 %v222_v36 }
 0x134   :  { %217 = vadd.xlane.f32.xlu0 %v216_v37 }
 0x1bc   :  { %v221_v40 = vpop.xlane.xlu1 %220 }
 0x1bd   :  { %v215_v42 = vpop.xlane.xlu0 %214  ;;  %v246_v45 = vrot.slane %v221_v40, %v234_v41 }
 0x1be   :  { %v235_v48 = vrot.slane %v215_v42, %v234_v41 }
 0x1c0   :  { %v224_v44 = vpop.xlane.xlu1 %223 }
 0x1c1   :  { %v250_v46 = vrot.slane %v224_v44, %v239_v43  ;;  %v218_v47 = vpop.xlane.xlu0 %217 }
 0x1c2   :  { %v240_v49 = vrot.slane %v218_v47, %v239_v43 }
 0x1c3   :  { %v251_v50 = vsel %vm241_vm2, %v250_v46, %v246_v45 }
 0x1c4   :  { %v242_v51 = vsel %vm241_vm2, %v240_v49, %v235_v48 }
 0x1c5   :  { %v253_v52 = vsel %vm252_vm3, %v251_v50, %v242_v51 }
 0x1c6   :  { %v255_v53 = vsel %vm227_vm4, %v253_v52, -inf }
 0x1c7   :  { %v257_v54 = vsel %vm256_vm5, %v255_v53, -inf }
 0x1c8   :  { %258 = vmax.xlane.f32.xlu0 %v257_v54 }
 0x255   :  { %v259_v55 = vpop.xlane.xlu0 %258 }
 0x256   :  { %v260_v56 = vsub.f32 %v255_v53, %v259_v55 }
 0x258   :  { %v261_v57 = vmul.f32 1.442695, %v260_v56 }
 0x25a   :  { %389 = vpow2.f32 %v261_v57 }
 0x264   :  { %v390_v58 = vpop.eup %389 }
 0x265   :  { %v263_v59 = vsel %vm256_vm5, %v390_v58, 0.0 }
 0x266   :  { %264 = vadd.xlane.f32.xlu1 %v263_v59 }
 0x2f3   :  { %v265_v60 = vpop.xlane.xlu1 %264 }
 0x2f4   :  { %391 = vrcp.f32 %v265_v60 }
 0x2fe   :  { %v392_v61 = vpop.eup %391 }
 0x2ff   :  { %v267_v62 = vmul.f32 %v392_v61, %v390_v58 }
 0x301   :  { %v276_v63 = vrot.slane %v267_v62, %v641_v13  ;;  %268 = vst.msk [vmem:[#allocation11] sm:$0x3] %vm256_vm5, %v267_v62  ;;  %v287_v1 = vrot.slane %v267_v62, %v286_v0 }
 0x303   :  { %282 = vbcast.lane.b32.xlu1 %v276_v63, 264  ;;  %278 = vbcast.lane.b32.xlu0 %v276_v63, 256 }
 0x307   :  { %289 = vbcast.lane.b32.xlu1 %v287_v1, 256 }
 0x30b   :  { %293 = vbcast.lane.b32.xlu1 %v287_v1, 264 }
 0x30c   :  { %492 = shalt.err (!%p489_p8)
}
 0x30d   :  { %s493_s19 = scalar_lea.hbm %s691_s5, 32 }
 0x30e   :  { %p494_p9 = scmp.ne.s32.totalorder %s691_s5, %s493_s19  ;;  %p497_p10 = scmp.lt.u32.totalorder %s493_s19, %s691_s5 }
 0x310   :  { %p499_p11 = pnand %p497_p10, %p494_p9 }
 0x312   :  { %502 = shalt.err (!%p499_p11)
}
 0x313   :  { %342 = dma.vmem_to_hbm [thread:$0]  %s340_s15, 32, %s691_s5, [#allocation12]   ;;  %v270_v4 = vunpack.c.h.bf16 %v629_v2  ;;  %v269_v5 = vunpack.c.l.bf16 %v629_v2  ;;  %v271_v12 = vunpack.c.l.bf16 %v631_v3  ;;  %v272_v15 = vunpack.c.h.bf16 %v631_v3 }
 0x314   :  { %s543_s5 = smov [#allocation10]   ;;  %vm321_vm6 = vcmask 254976  }
 0x315   :  { %s329_s27 = sshll.u32 %s543_s5, 4  ;;  %s330_s27 = int_to_ptr.vmem [resolvable:$true] %s329_s27 }
 0x316   :  { %s503_s28 = scalar_lea.vmem %s330_s27, 32  ;;  %p508_p13 = scmp.lt.s32.totalorder %s330_s27, %s330_s27 }
 0x317   :  { %p504_p12 = scmp.ne.s32.totalorder %s330_s27, %s503_s28  ;;  %p509_p0 = scmp.lt.s32.totalorder %s503_s28, %s503_s28 }
 0x319   :  { %p510_p1 = por %p509_p0, %p508_p13 }
 0x31b   :  { %p511_p2 = pnand %p510_p1, %p504_p12 }
 0x375   :  { %v283_v6 = vpop.permute.xlu1 %282  ;;  %v279_v7 = vpop.permute.xlu0 %278 }
 0x376   :  { %v296_v8 = vmul.f32 %v283_v6, %v270_v4  ;;  %v295_v9 = vmul.f32 %v279_v7, %v269_v5 }
 0x378   :  { %v300_v10 = vsel %vm103_vm0, %v296_v8, 0.0  ;;  %v299_v11 = vsel %vm103_vm0, %v295_v9, 0.0 }
 0x379   :  { %v301_v13 = vadd.f32 %v300_v10, %v299_v11  ;;  %v290_v14 = vpop.permute.xlu1 %289 }
 0x37a   :  { %v297_v17 = vmul.f32 %v290_v14, %v271_v12 }
 0x37b   :  { %v302_v16 = vrot.slane %v301_v13, 4 }
 0x37c   :  { %v308_v2 = vsel %vm103_vm0, %v297_v17, 0.0 }
 0x37d   :  { %v303_v18 = vadd.f32 %v302_v16, %v301_v13  ;;  %v294_v19 = vpop.permute.xlu1 %293 }
 0x37e   :  { %v298_v20 = vmul.f32 %v294_v19, %v272_v15 }
 0x37f   :  { %v304_v22 = vrot.slane %v303_v18, 2 }
 0x380   :  { %v309_v21 = vsel %vm103_vm0, %v298_v20, 0.0 }
 0x381   :  { %v310_v23 = vadd.f32 %v309_v21, %v308_v2  ;;  %v305_v25 = vadd.f32 %v304_v22, %v303_v18 }
 0x383   :  { %v311_v24 = vrot.slane %v310_v23, 4  ;;  %v306_v28 = vrot.slane %v305_v25, 1 }
 0x385   :  { %v312_v26 = vadd.f32 %v311_v24, %v310_v23  ;;  %v307_v3 = vadd.f32 %v306_v28, %v305_v25 }
 0x387   :  { %v313_v27 = vrot.slane %v312_v26, 2 }
 0x389   :  { %v314_v29 = vadd.f32 %v313_v27, %v312_v26 }
 0x38b   :  { %v315_v30 = vrot.slane %v314_v29, 1 }
 0x38d   :  { %v316_v31 = vadd.f32 %v315_v30, %v314_v29 }
 0x38f   :  { %v319_v32 = vsel %vm252_vm3, %v316_v31, %v307_v3 }
 0x390   :  { %322 = vst.msk [vmem:[#allocation10] sm:$0x3] %vm321_vm6, %v319_v32 }
 0x391   :  { %514 = shalt.err (!%p511_p2)
}
 0x392   :  { %s515_s21 = scalar_lea.hbm %s690_s4, 32 }
 0x393   :  { %p516_p3 = scmp.ne.s32.totalorder %s690_s4, %s515_s21  ;;  %p519_p4 = scmp.lt.u32.totalorder %s515_s21, %s690_s4 }
 0x395   :  { %p521_p5 = pnand %p519_p4, %p516_p3 }
 0x397   :  { %524 = shalt.err (!%p521_p5)
}
 0x398   :  { %332 = dma.vmem_to_hbm [thread:$0]  %s330_s27, 32, %s690_s4, [#allocation4]  }
 0x399   :  { %531 = dma.done.wait [#allocation4], 32  }
 0x39a   :  { %532 = vsyncadd [#allocation4], 4294967264 }
 0x39b   :  { %533 = dma.done.wait [#allocation12], 32  }
 0x39c   :  { %534 = vsyncadd [#allocation12], 4294967264 }
 0x39d   :  { %349 = vsyncpa [#allocation3], 1 }
 0x39e   :  { %350 = vsyncpa [#allocation6], 1 }
 0x39f   :  { %351 = vsyncpa [#allocation9], 1 }
 0x3a0   :  { %352 = vsyncpa [#allocation4], 1 }
 0x3a1   :  { %353 = vsyncpa [#allocation12], 1 }

</bundles_post_ra>
